<compile_context>
chip_gen: v6e
topology: v6e:2x2x1
jax: 0.10.0
libtpu: 0.0.40
codegen_flags: <defaults>
</compile_context>

<pallas_src>
import functools

import jax
import jax.numpy as jnp
from jax import lax
from jax.experimental import pallas as pl
from jax.experimental.pallas import tpu as pltpu


# --------------------------------------------------------------------------- #
# Helpers
# --------------------------------------------------------------------------- #
def _round_up(n, m):
    return ((n + m - 1) // m) * m


def _pad_to(a, rows=None, cols=None):
    r = 0 if rows is None else rows - a.shape[0]
    c = 0 if cols is None else cols - a.shape[1]
    if r == 0 and c == 0:
        return a
    return jnp.pad(a, ((0, r), (0, c)))


def _tpu_info():
    """(device_kind, is_v7, has_256_mxu, vmem_capacity_bytes) with safe fallbacks."""
    try:
        kind = jax.devices()[0].device_kind.lower()
    except Exception:  # pragma: no cover
        kind = ""
    is_v7 = ("v7" in kind) or ("tpu7" in kind)
    mxu256 = is_v7 or ("v6" in kind)
    vmem_cap = None
    try:
        vmem_cap = getattr(pltpu.get_tpu_info(), "vmem_capacity_bytes", None)
    except Exception:  # pragma: no cover
        vmem_cap = None
    if not vmem_cap:
        if is_v7:
            vmem_cap = 64 << 20
        elif ("v5" in kind) or ("v6" in kind):
            vmem_cap = 128 << 20
        else:
            vmem_cap = 64 << 20      # conservative default
    return kind, is_v7, mxu256, int(vmem_cap)


# --------------------------------------------------------------------------- #
# Kernel
# --------------------------------------------------------------------------- #
def _mlp_disc_kernel(x_ref, y_ref,
                     w1x_ref, w1y_ref, b1_ref,
                     w2_ref, b2_ref,
                     w3_ref, b3_ref,
                     w4_ref, b4_ref,
                     o_ref):
    # In-kernel bf16 cast of the f32 batch tiles (rides the free VPU slot).
    xb = x_ref[...].astype(jnp.bfloat16)
    yb = y_ref[...].astype(jnp.bfloat16)

    # Layer 1: Linear(2*D -> H) + ReLU; concat replaced by split-weight matmuls.
    h = (jnp.dot(xb, w1x_ref[...], preferred_element_type=jnp.float32)
         + jnp.dot(yb, w1y_ref[...], preferred_element_type=jnp.float32)
         + b1_ref[...])
    h = jnp.maximum(h, 0.0)

    # Layer 2: Linear(H -> H) + ReLU.
    h = jnp.dot(h.astype(jnp.bfloat16), w2_ref[...],
                preferred_element_type=jnp.float32) + b2_ref[...]
    h = jnp.maximum(h, 0.0)

    # Layer 3: Linear(H -> H) + ReLU.
    h = jnp.dot(h.astype(jnp.bfloat16), w3_ref[...],
                preferred_element_type=jnp.float32) + b3_ref[...]
    h = jnp.maximum(h, 0.0)

    # Layer 4: Linear(H -> 1) + Sigmoid, emitted lane-dense as a (1, tb) row:
    #   z[0, j] = sum_k w4[0, k] * h[j, k]   (trans-B MXU pass, no relayout).
    z = lax.dot_general(w4_ref[...], h.astype(jnp.bfloat16),
                        dimension_numbers=(((1,), (1,)), ((), ())),
                        preferred_element_type=jnp.float32)
    z = z + b4_ref[0, 0]
    o_ref[...] = jax.nn.sigmoid(z).astype(o_ref.dtype)


# --------------------------------------------------------------------------- #
# One-time weight preparation (hoisted out of the per-call path)
# --------------------------------------------------------------------------- #
def prepare_params(params, input_dim):
    """Split W1 into x/y halves, zero-pad the hidden axis to the MXU-aligned
    width, cast weights to bf16 (biases stay f32).  Call once, reuse forever."""
    D = int(input_dim)
    H = params["w1"].shape[1]
    assert params["w1"].shape[0] == 2 * D
    _, _, mxu256, _ = _tpu_info()
    align = 256 if (mxu256 and H > 128) else 128
    H_pad = _round_up(max(H, 1), align)

    w1 = jnp.asarray(params["w1"], jnp.float32)
    return dict(
        w1x=_pad_to(w1[:D], cols=H_pad).astype(jnp.bfloat16),            # (D, Hp)
        w1y=_pad_to(w1[D:], cols=H_pad).astype(jnp.bfloat16),            # (D, Hp)
        b1=_pad_to(jnp.asarray(params["b1"], jnp.float32), cols=H_pad),  # (1, Hp)
        w2=_pad_to(jnp.asarray(params["w2"], jnp.float32),
                   rows=H_pad, cols=H_pad).astype(jnp.bfloat16),         # (Hp, Hp)
        b2=_pad_to(jnp.asarray(params["b2"], jnp.float32), cols=H_pad),
        w3=_pad_to(jnp.asarray(params["w3"], jnp.float32),
                   rows=H_pad, cols=H_pad).astype(jnp.bfloat16),
        b3=_pad_to(jnp.asarray(params["b3"], jnp.float32), cols=H_pad),
        w4=_pad_to(jnp.asarray(params["w4"], jnp.float32).T,
                   cols=H_pad).astype(jnp.bfloat16),                     # (1, Hp)
        b4=jnp.asarray(params["b4"], jnp.float32).reshape(1, 1),         # SMEM scalar
    )


# --------------------------------------------------------------------------- #
# Forward pass
# --------------------------------------------------------------------------- #
@functools.partial(jax.jit, static_argnames=("block_b",))
def mlp_discriminator_forward(x, y, prep, *, block_b=None):
    """x, y: (B, input_dim) -> (B, 1) float32 in (0, 1)."""
    B, D = x.shape
    assert y.shape == (B, D)
    assert prep["w1x"].shape[0] == D
    H_pad = prep["w1x"].shape[1]

    _, is_v7, _, vmem_cap = _tpu_info()

    # ---- VMEM accounting ---------------------------------------------------
    vmem_limit = int(max(min(vmem_cap - (8 << 20), 100 << 20), 32 << 20))
    # Resident (single-buffered) weight/bias footprint.
    w_bytes = (2 * D * H_pad * 2           # w1x + w1y (bf16)
               + 2 * H_pad * H_pad * 2     # w2 + w3   (bf16)
               + 3 * H_pad * 4             # b1..b3    (f32)
               + H_pad * 2)                # w4 row    (bf16)
    # Per batch-row cost: f32 x/y tiles (double-buffered), in-kernel bf16
    # copies of x/y, f32 h (+ a live temp) + bf16 cast copies, f32 out row x2.
    per_row = (2 * D * 4) * 2 + 2 * D * 2 + H_pad * (4 + 4 + 2 + 2) + 4 * 2
    budget = max(vmem_limit - w_bytes - (4 << 20), 0)
    cap = max(8, min(2048, (budget // per_row) // 8 * 8))

    # ---- tile selection (generation-gated) ----------------------------------
    if block_b is not None:
        tb = max(8, (int(block_b) // 8) * 8)
        num_tiles = -(-B // tb)
    else:
        num_tiles = max(1, -(-B // cap))
        if is_v7:
            # Two TensorCores: make sure both get work, keep step count even.
            if num_tiles == 1 and B >= 16:
                num_tiles = 2
            if num_tiles > 1 and num_tiles % 2:
                num_tiles += 1
        tb = max(8, _round_up(-(-B // num_tiles), 8))
    B_pad = num_tiles * tb

    xb = x.astype(jnp.float32)
    yb = y.astype(jnp.float32)
    if B_pad != B:
        xb = jnp.pad(xb, ((0, B_pad - B), (0, 0)))
        yb = jnp.pad(yb, ((0, B_pad - B), (0, 0)))

    row = lambda i: (i, 0)
    rep = lambda i: (0, 0)
    resident = dict(pipeline_mode=pl.Buffered(1))   # fetched once, never re-DMA'd

    out = pl.pallas_call(
        _mlp_disc_kernel,
        out_shape=jax.ShapeDtypeStruct((num_tiles, 1, tb), jnp.float32),
        grid_spec=pltpu.PrefetchScalarGridSpec(
            num_scalar_prefetch=0,
            grid=(num_tiles,),
            in_specs=[
                pl.BlockSpec((tb, D), row),                          # x tile (f32)
                pl.BlockSpec((tb, D), row),                          # y tile (f32)
                pl.BlockSpec((D, H_pad), rep, **resident),           # w1x
                pl.BlockSpec((D, H_pad), rep, **resident),           # w1y
                pl.BlockSpec((1, H_pad), rep, **resident),           # b1
                pl.BlockSpec((H_pad, H_pad), rep, **resident),       # w2
                pl.BlockSpec((1, H_pad), rep, **resident),           # b2
                pl.BlockSpec((H_pad, H_pad), rep, **resident),       # w3
                pl.BlockSpec((1, H_pad), rep, **resident),           # b3
                pl.BlockSpec((1, H_pad), rep, **resident),           # w4 row
                pl.BlockSpec(memory_space=pltpu.MemorySpace.SMEM),   # b4 scalar
            ],
            out_specs=pl.BlockSpec((None, 1, tb), lambda i: (i, 0, 0)),
        ),
        compiler_params=pltpu.CompilerParams(
            dimension_semantics=("parallel",),
            vmem_limit_bytes=vmem_limit),
    )(xb, yb, prep["w1x"], prep["w1y"], prep["b1"], prep["w2"], prep["b2"],
      prep["w3"], prep["b3"], prep["w4"], prep["b4"])

    return out.reshape(B_pad, 1)[:B]


# --------------------------------------------------------------------------- #
# Reference / demo
# --------------------------------------------------------------------------- #
def init_params(key, input_dim, hidden_dim):
    """nn.Linear-style U(-1/sqrt(fan_in), +1/sqrt(fan_in)) init."""
    def linear(k, fan_in, fan_out):
        kw, kb = jax.random.split(k)
        bound = 1.0 / jnp.sqrt(fan_in)
        w = jax.random.uniform(kw, (fan_in, fan_out), jnp.float32, -bound, bound)
        b = jax.random.uniform(kb, (1, fan_out), jnp.float32, -bound, bound)
        return w, b

    k1, k2, k3, k4 = jax.random.split(key, 4)
    w1, b1 = linear(k1, input_dim * 2, hidden_dim)
    w2, b2 = linear(k2, hidden_dim, hidden_dim)
    w3, b3 = linear(k3, hidden_dim, hidden_dim)
    w4, b4 = linear(k4, hidden_dim, 1)
    return dict(w1=w1, b1=b1, w2=w2, b2=b2, w3=w3, b3=b3, w4=w4, b4=b4)


def reference_forward(x, y, p):
    h = jnp.concatenate([x, y], axis=1)
    h = jax.nn.relu(h @ p["w1"] + p["b1"])
    h = jax.nn.relu(h @ p["w2"] + p["b2"])
    h = jax.nn.relu(h @ p["w3"] + p["b3"])
    return jax.nn.sigmoid(h @ p["w4"] + p["b4"])


if __name__ == "__main__":
    key = jax.random.PRNGKey(0)
    k_params, kx, ky = jax.random.split(key, 3)

    batch = 8
    input_dim = 16
    hidden_dim = 32

    params = init_params(k_params, input_dim, hidden_dim)
    x = jax.random.normal(kx, (batch, input_dim), jnp.float32)
    y = jax.random.normal(ky, (batch, input_dim), jnp.float32)

    prep = prepare_params(params, input_dim)       # one-time weight prep
    out = mlp_discriminator_forward(x, y, prep)
    out = jax.block_until_ready(out)

    ref = reference_forward(x, y, params)
    assert out.shape == (batch, 1), out.shape
    max_err = float(jnp.max(jnp.abs(out - ref)))
    # bf16 weight/activation carriage (f32 accumulation) -> loose tolerance.
    assert max_err < 5e-2, (max_err, out, ref)

    print("KERNEL_OK")
</pallas_src>

<mosaic_0001>
module attributes {stable_mosaic.version = 11 : i64} {
  func.func @_mlp_disc_kernel(%arg0: i32, %arg1: memref<8x16xf32, #tpu.memory_space<vmem>>, %arg2: memref<8x16xf32, #tpu.memory_space<vmem>>, %arg3: memref<16x128xbf16, #tpu.memory_space<vmem>>, %arg4: memref<16x128xbf16, #tpu.memory_space<vmem>>, %arg5: memref<1x128xf32, #tpu.memory_space<vmem>>, %arg6: memref<128x128xbf16, #tpu.memory_space<vmem>>, %arg7: memref<1x128xf32, #tpu.memory_space<vmem>>, %arg8: memref<128x128xbf16, #tpu.memory_space<vmem>>, %arg9: memref<1x128xf32, #tpu.memory_space<vmem>>, %arg10: memref<1x128xbf16, #tpu.memory_space<vmem>>, %arg11: memref<1x1xf32, #tpu.memory_space<smem>>, %arg12: memref<1x1x8xf32, #tpu.memory_space<vmem>>) attributes {dimension_semantics = [#tpu.dimension_semantics<parallel>], iteration_bounds = array<i64: 1>, scalar_prefetch = 0 : i64, scratch_operands = 0 : i64, tpu.core_type = #tpu.core_type<tc>, window_params = [{transform_indices = @transform_0, window_bounds = array<i64: 8, 16>}, {transform_indices = @transform_1, window_bounds = array<i64: 8, 16>}, {pipeline_mode = #tpu.pipeline_mode<synchronous>, transform_indices = @transform_2, window_bounds = array<i64: 16, 128>}, {pipeline_mode = #tpu.pipeline_mode<synchronous>, transform_indices = @transform_3, window_bounds = array<i64: 16, 128>}, {pipeline_mode = #tpu.pipeline_mode<synchronous>, transform_indices = @transform_4, window_bounds = array<i64: 1, 128>}, {pipeline_mode = #tpu.pipeline_mode<synchronous>, transform_indices = @transform_5, window_bounds = array<i64: 128, 128>}, {pipeline_mode = #tpu.pipeline_mode<synchronous>, transform_indices = @transform_6, window_bounds = array<i64: 1, 128>}, {pipeline_mode = #tpu.pipeline_mode<synchronous>, transform_indices = @transform_7, window_bounds = array<i64: 128, 128>}, {pipeline_mode = #tpu.pipeline_mode<synchronous>, transform_indices = @transform_8, window_bounds = array<i64: 1, 128>}, {pipeline_mode = #tpu.pipeline_mode<synchronous>, transform_indices = @transform_9, window_bounds = array<i64: 1, 128>}, {transform_indices = @transform_10, window_bounds = array<i64: 1, 1>}, {transform_indices = @transform_11, window_bounds = array<i64: 1, 1, 8>}]} {
    %c0 = arith.constant 0 : index
    %c0_0 = arith.constant 0 : index
    %0 = vector.load %arg1[%c0, %c0_0] : memref<8x16xf32, #tpu.memory_space<vmem>>, vector<8x16xf32>
    %1 = arith.truncf %0 : vector<8x16xf32> to vector<8x16xbf16>
    %c0_1 = arith.constant 0 : index
    %c0_2 = arith.constant 0 : index
    %2 = vector.load %arg2[%c0_1, %c0_2] : memref<8x16xf32, #tpu.memory_space<vmem>>, vector<8x16xf32>
    %3 = arith.truncf %2 : vector<8x16xf32> to vector<8x16xbf16>
    %c0_3 = arith.constant 0 : index
    %c0_4 = arith.constant 0 : index
    %4 = vector.load %arg3[%c0_3, %c0_4] : memref<16x128xbf16, #tpu.memory_space<vmem>>, vector<16x128xbf16>
    %cst = arith.constant dense<0.000000e+00> : vector<8x128xf32>
    %5 = tpu.matmul %1, %4, %cst {dimension_numbers = #tpu.dot_dimension_numbers<[1], [0], [0], [1], [0, 0, 1, 1], [], []>} : vector<8x16xbf16>, vector<16x128xbf16>, vector<8x128xf32> -> vector<8x128xf32>
    %c0_5 = arith.constant 0 : index
    %c0_6 = arith.constant 0 : index
    %6 = vector.load %arg4[%c0_5, %c0_6] : memref<16x128xbf16, #tpu.memory_space<vmem>>, vector<16x128xbf16>
    %cst_7 = arith.constant dense<0.000000e+00> : vector<8x128xf32>
    %7 = tpu.matmul %3, %6, %cst_7 {dimension_numbers = #tpu.dot_dimension_numbers<[1], [0], [0], [1], [0, 0, 1, 1], [], []>} : vector<8x16xbf16>, vector<16x128xbf16>, vector<8x128xf32> -> vector<8x128xf32>
    %8 = arith.addf %5, %7 : vector<8x128xf32>
    %c0_8 = arith.constant 0 : index
    %c0_9 = arith.constant 0 : index
    %9 = vector.load %arg5[%c0_8, %c0_9] : memref<1x128xf32, #tpu.memory_space<vmem>>, vector<1x128xf32>
    %10 = vector.broadcast %9 : vector<1x128xf32> to vector<8x128xf32>
    %11 = arith.addf %8, %10 : vector<8x128xf32>
    %cst_10 = arith.constant 0.000000e+00 : f32
    %12 = vector.broadcast %cst_10 : f32 to vector<8x128xf32>
    %13 = arith.maximumf %11, %12 : vector<8x128xf32>
    %14 = arith.truncf %13 : vector<8x128xf32> to vector<8x128xbf16>
    %c0_11 = arith.constant 0 : index
    %c0_12 = arith.constant 0 : index
    %15 = vector.load %arg6[%c0_11, %c0_12] : memref<128x128xbf16, #tpu.memory_space<vmem>>, vector<128x128xbf16>
    %cst_13 = arith.constant dense<0.000000e+00> : vector<8x128xf32>
    %16 = tpu.matmul %14, %15, %cst_13 {dimension_numbers = #tpu.dot_dimension_numbers<[1], [0], [0], [1], [0, 0, 1, 1], [], []>} : vector<8x128xbf16>, vector<128x128xbf16>, vector<8x128xf32> -> vector<8x128xf32>
    %c0_14 = arith.constant 0 : index
    %c0_15 = arith.constant 0 : index
    %17 = vector.load %arg7[%c0_14, %c0_15] : memref<1x128xf32, #tpu.memory_space<vmem>>, vector<1x128xf32>
    %18 = vector.broadcast %17 : vector<1x128xf32> to vector<8x128xf32>
    %19 = arith.addf %16, %18 : vector<8x128xf32>
    %cst_16 = arith.constant 0.000000e+00 : f32
    %20 = vector.broadcast %cst_16 : f32 to vector<8x128xf32>
    %21 = arith.maximumf %19, %20 : vector<8x128xf32>
    %22 = arith.truncf %21 : vector<8x128xf32> to vector<8x128xbf16>
    %c0_17 = arith.constant 0 : index
    %c0_18 = arith.constant 0 : index
    %23 = vector.load %arg8[%c0_17, %c0_18] : memref<128x128xbf16, #tpu.memory_space<vmem>>, vector<128x128xbf16>
    %cst_19 = arith.constant dense<0.000000e+00> : vector<8x128xf32>
    %24 = tpu.matmul %22, %23, %cst_19 {dimension_numbers = #tpu.dot_dimension_numbers<[1], [0], [0], [1], [0, 0, 1, 1], [], []>} : vector<8x128xbf16>, vector<128x128xbf16>, vector<8x128xf32> -> vector<8x128xf32>
    %c0_20 = arith.constant 0 : index
    %c0_21 = arith.constant 0 : index
    %25 = vector.load %arg9[%c0_20, %c0_21] : memref<1x128xf32, #tpu.memory_space<vmem>>, vector<1x128xf32>
    %26 = vector.broadcast %25 : vector<1x128xf32> to vector<8x128xf32>
    %27 = arith.addf %24, %26 : vector<8x128xf32>
    %cst_22 = arith.constant 0.000000e+00 : f32
    %28 = vector.broadcast %cst_22 : f32 to vector<8x128xf32>
    %29 = arith.maximumf %27, %28 : vector<8x128xf32>
    %c0_23 = arith.constant 0 : index
    %c0_24 = arith.constant 0 : index
    %30 = vector.load %arg10[%c0_23, %c0_24] : memref<1x128xbf16, #tpu.memory_space<vmem>>, vector<1x128xbf16>
    %31 = arith.truncf %29 : vector<8x128xf32> to vector<8x128xbf16>
    %cst_25 = arith.constant dense<0.000000e+00> : vector<1x8xf32>
    %32 = tpu.matmul %30, %31, %cst_25 {dimension_numbers = #tpu.dot_dimension_numbers<[1], [1], [0], [0], [0, 0, 1, 0], [], []>} : vector<1x128xbf16>, vector<8x128xbf16>, vector<1x8xf32> -> vector<1x8xf32>
    %c0_26 = arith.constant 0 : index
    %c0_27 = arith.constant 0 : index
    %33 = memref.load %arg11[%c0_26, %c0_27] : memref<1x1xf32, #tpu.memory_space<smem>>
    %34 = vector.broadcast %33 : f32 to vector<1x8xf32>
    %35 = arith.addf %32, %34 : vector<1x8xf32>
    %36 = arith.negf %35 : vector<1x8xf32>
    %37 = math.exp %36 : vector<1x8xf32>
    %cst_28 = arith.constant 1.000000e+00 : f32
    %38 = vector.broadcast %cst_28 : f32 to vector<1x8xf32>
    %39 = arith.addf %38, %37 : vector<1x8xf32>
    %40 = arith.divf %38, %39 : vector<1x8xf32>
    %c0_29 = arith.constant 0 : index
    %c0_30 = arith.constant 0 : index
    %c0_31 = arith.constant 0 : index
    %41 = vector.load %arg12[%c0_29, %c0_30, %c0_31] : memref<1x1x8xf32, #tpu.memory_space<vmem>>, vector<1x1x8xf32>
    %42 = vector.shape_cast %41 : vector<1x1x8xf32> to vector<1x8xf32>
    %43 = vector.shape_cast %40 : vector<1x8xf32> to vector<1x1x8xf32>
    tpu.vector_store %arg12[%c0_29, %c0_30, %c0_31], %43 {strides = array<i32>} : memref<1x1x8xf32, #tpu.memory_space<vmem>>, vector<1x1x8xf32>,
    return
  }
  func.func @transform_0(%arg0: i32) -> (i32, i32) {
    %c0_i32 = arith.constant 0 : i32
    %c0_i32_0 = arith.constant 0 : i32
    return %arg0, %c0_i32 : i32, i32
  }
  func.func @transform_1(%arg0: i32) -> (i32, i32) {
    %c0_i32 = arith.constant 0 : i32
    %c0_i32_0 = arith.constant 0 : i32
    return %arg0, %c0_i32 : i32, i32
  }
  func.func @transform_2(%arg0: i32) -> (i32, i32) {
    %c0_i32 = arith.constant 0 : i32
    %c0_i32_0 = arith.constant 0 : i32
    %c0_i32_1 = arith.constant 0 : i32
    return %c0_i32, %c0_i32_0 : i32, i32
  }
  func.func @transform_3(%arg0: i32) -> (i32, i32) {
    %c0_i32 = arith.constant 0 : i32
    %c0_i32_0 = arith.constant 0 : i32
    %c0_i32_1 = arith.constant 0 : i32
    return %c0_i32, %c0_i32_0 : i32, i32
  }
  func.func @transform_4(%arg0: i32) -> (i32, i32) {
    %c0_i32 = arith.constant 0 : i32
    %c0_i32_0 = arith.constant 0 : i32
    %c0_i32_1 = arith.constant 0 : i32
    return %c0_i32, %c0_i32_0 : i32, i32
  }
  func.func @transform_5(%arg0: i32) -> (i32, i32) {
    %c0_i32 = arith.constant 0 : i32
    %c0_i32_0 = arith.constant 0 : i32
    %c0_i32_1 = arith.constant 0 : i32
    return %c0_i32, %c0_i32_0 : i32, i32
  }
  func.func @transform_6(%arg0: i32) -> (i32, i32) {
    %c0_i32 = arith.constant 0 : i32
    %c0_i32_0 = arith.constant 0 : i32
    %c0_i32_1 = arith.constant 0 : i32
    return %c0_i32, %c0_i32_0 : i32, i32
  }
  func.func @transform_7(%arg0: i32) -> (i32, i32) {
    %c0_i32 = arith.constant 0 : i32
    %c0_i32_0 = arith.constant 0 : i32
    %c0_i32_1 = arith.constant 0 : i32
    return %c0_i32, %c0_i32_0 : i32, i32
  }
  func.func @transform_8(%arg0: i32) -> (i32, i32) {
    %c0_i32 = arith.constant 0 : i32
    %c0_i32_0 = arith.constant 0 : i32
    %c0_i32_1 = arith.constant 0 : i32
    return %c0_i32, %c0_i32_0 : i32, i32
  }
  func.func @transform_9(%arg0: i32) -> (i32, i32) {
    %c0_i32 = arith.constant 0 : i32
    %c0_i32_0 = arith.constant 0 : i32
    %c0_i32_1 = arith.constant 0 : i32
    return %c0_i32, %c0_i32_0 : i32, i32
  }
  func.func @transform_10(%arg0: i32) -> (i32, i32) {
    %c0_i32 = arith.constant 0 : i32
    %c0_i32_0 = arith.constant 0 : i32
    %c0_i32_1 = arith.constant 0 : i32
    return %c0_i32, %c0_i32_0 : i32, i32
  }
  func.func @transform_11(%arg0: i32) -> (i32, i32, i32) {
    %c0_i32 = arith.constant 0 : i32
    %c0_i32_0 = arith.constant 0 : i32
    %c0_i32_1 = arith.constant 0 : i32
    return %arg0, %c0_i32, %c0_i32_0 : i32, i32, i32
  }
}

</mosaic_0001>

<bundles_post_ra>
// kernel: mlp_discriminator_forward.1
= control target key start
LH: loop header
LB: loop body
LE: loop exit
PB: predicated region body
PF: predicated region fallthrough
CT: control target
= control target key end

     0   :  { %17 = vsyncpa [#allocation4], 0  ;;  %s926_s0 = inlined_call_operand.hbm [shape: f32[8,16], index: 0, kind: input, shape index: {}]   ;;  %s927_s1 = inlined_call_operand.hbm [shape: f32[8,16], index: 1, kind: input, shape index: {}]   ;;  %s928_s2 = inlined_call_operand.vmem [shape: bf16[16,128], index: 2, kind: input, shape index: {}]   ;;  %s929_s3 = inlined_call_operand.hbm [shape: bf16[16,128], index: 3, kind: input, shape index: {}]   ;;  %s930_s4 = inlined_call_operand.vmem [shape: f32[1,128], index: 4, kind: input, shape index: {}]   ;;  %s931_s5 = inlined_call_operand.hbm [shape: bf16[128,128], index: 5, kind: input, shape index: {}]   ;;  %s932_s6 = inlined_call_operand.vmem [shape: f32[1,128], index: 6, kind: input, shape index: {}]   ;;  %s933_s7 = inlined_call_operand.hbm [shape: bf16[128,128], index: 7, kind: input, shape index: {}]   ;;  %s934_s8 = inlined_call_operand.vmem [shape: f32[1,128], index: 8, kind: input, shape index: {}]   ;;  %s935_s9 = inlined_call_operand.vmem [shape: bf16[1,128], index: 9, kind: input, shape index: {}]   ;;  %s936_s10 = inlined_call_operand.<no memory space> [shape: f32[1,1], index: 10, kind: input, shape index: {}]   ;;  %s937_s11 = inlined_call_operand.hbm [shape: f32[1,1,8], index: 11, kind: output, shape index: {}]  }
   0x1   :  { %18 = vsyncpa [#allocation7], 0 }
   0x2   :  { %19 = vsyncpa [#allocation10], 0 }
   0x3   :  { %20 = vsyncpa [#allocation5], 0  ;;  %s782_s17 = smov [#allocation6]  }
   0x4   :  { %s37_s18 = sshll.u32 %s782_s17, 4  ;;  %s38_s18 = int_to_ptr.vmem [resolvable:$true] %s37_s18 }
   0x5   :  { %s662_s19 = scalar_lea.vmem %s38_s18, 128  ;;  %p667_p1 = scmp.lt.s32.totalorder %s38_s18, %s38_s18 }
   0x6   :  { %p663_p0 = scmp.ne.s32.totalorder %s38_s18, %s662_s19  ;;  %p668_p2 = scmp.lt.s32.totalorder %s662_s19, %s662_s19 }
   0x8   :  { %p669_p3 = por %p668_p2, %p667_p1 }
   0xa   :  { %p670_p4 = pnand %p669_p3, %p663_p0 }
   0xc   :  { %673 = shalt.err (!%p670_p4)
}
   0xd   :  { %40 = dma.hbm_to_vmem [thread:$0]  %s927_s1, 128, %s38_s18, [#allocation7]  }
   0xe   :  { %s783_s22 = smov [#allocation9]   ;;  %s784_s24 = smov [#allocation3]  }
   0xf   :  { %s62_s23 = sshll.u32 %s783_s22, 4  ;;  %s27_s25 = sshll.u32 %s784_s24, 4  ;;  %s63_s23 = int_to_ptr.vmem [resolvable:$true] %s62_s23  ;;  %s28_s25 = int_to_ptr.vmem [resolvable:$true] %s27_s25 }
  0x10   :  { %s682_s26 = scalar_lea.vmem %s63_s23, 1024  ;;  %p687_p6 = scmp.lt.s32.totalorder %s63_s23, %s63_s23 }
  0x11   :  { %p683_p5 = scmp.ne.s32.totalorder %s63_s23, %s682_s26  ;;  %p688_p7 = scmp.lt.s32.totalorder %s682_s26, %s682_s26 }
  0x13   :  { %p689_p8 = por %p688_p7, %p687_p6 }
  0x15   :  { %p690_p9 = pnand %p689_p8, %p683_p5 }
  0x17   :  { %693 = shalt.err (!%p690_p9)
}
  0x18   :  { %s785_s27 = smov 64   ;;  %s786_s28 = smov 4  }
  0x19   :  { %68 = dma.hbm_to_vmem [thread:$0]  %s931_s5, 1024, %s63_s23, [#allocation10], %s785_s27, %s785_s27, %s786_s28  }
  0x1a   :  { %s702_s1 = scalar_lea.vmem %s28_s25, 128  ;;  %p707_p11 = scmp.lt.s32.totalorder %s28_s25, %s28_s25 }
  0x1b   :  { %p703_p10 = scmp.ne.s32.totalorder %s28_s25, %s702_s1  ;;  %p708_p12 = scmp.lt.s32.totalorder %s702_s1, %s702_s1 }
  0x1d   :  { %p709_p13 = por %p708_p12, %p707_p11 }
  0x1f   :  { %p710_p0 = pnand %p709_p13, %p703_p10 }
  0x21   :  { %713 = shalt.err (!%p710_p0)
}
  0x22   :  { %30 = dma.hbm_to_vmem [thread:$0]  %s926_s0, 128, %s28_s25, [#allocation4]  }
  0x23   :  { %s787_s14 = smov [#allocation8]   ;;  %s788_s16 = smov [#allocation11]  }
  0x24   :  { %s48_s15 = sshll.u32 %s787_s14, 4  ;;  %s76_s17 = sshll.u32 %s788_s16, 4  ;;  %s49_s15 = int_to_ptr.vmem [resolvable:$true] %s48_s15  ;;  %s77_s17 = int_to_ptr.vmem [resolvable:$true] %s76_s17 }
  0x25   :  { %s722_s18 = scalar_lea.vmem %s49_s15, 128  ;;  %p727_p2 = scmp.lt.s32.totalorder %s49_s15, %s49_s15 }
  0x26   :  { %p723_p1 = scmp.ne.s32.totalorder %s49_s15, %s722_s18  ;;  %p728_p3 = scmp.lt.s32.totalorder %s722_s18, %s722_s18 }
  0x28   :  { %p729_p4 = por %p728_p3, %p727_p2 }
  0x2a   :  { %p730_p5 = pnand %p729_p4, %p723_p1 }
  0x2c   :  { %733 = shalt.err (!%p730_p5)
}
  0x2d   :  { %54 = dma.hbm_to_vmem [thread:$0]  %s929_s3, 128, %s49_s15, [#allocation7], %s785_s27, %s785_s27, %s786_s28  }
  0x2e   :  { %s742_s0 = scalar_lea.vmem %s77_s17, 1024  ;;  %p747_p7 = scmp.lt.s32.totalorder %s77_s17, %s77_s17 }
  0x2f   :  { %p743_p6 = scmp.ne.s32.totalorder %s77_s17, %s742_s0  ;;  %p748_p8 = scmp.lt.s32.totalorder %s742_s0, %s742_s0 }
  0x31   :  { %p749_p9 = por %p748_p8, %p747_p7 }
  0x33   :  { %p750_p10 = pnand %p749_p9, %p743_p6 }
  0x35   :  { %753 = shalt.err (!%p750_p10)
}
  0x36   :  { %82 = dma.hbm_to_vmem [thread:$0]  %s933_s7, 1024, %s77_s17, [#allocation10], %s785_s27, %s785_s27, %s786_s28  }
  0x37   :  { %774 = dma.done.wait [#allocation4], 128  }
  0x38   :  { %775 = vsyncadd [#allocation4], 4294967168 }
  0x39   :  { %776 = dma.done.wait [#allocation7], 256  }
  0x3a   :  { %777 = vsyncadd [#allocation7], 4294967040 }
  0x3b   :  { %778 = dma.done.wait [#allocation10], 2048  }
  0x3c   :  { %779 = vsyncadd [#allocation10], 4294965248  ;;  %v789_v0 = vmov 0.0   ;;  %vm790_vm0 = vmmov 0   ;;  %v632_v1 = vld [vmem:[#allocation8] sm:$0xff]   ;;  %v633_v2 = vld [vmem:[%s928_s2] sm:$0xff]   ;;  %v450_v53 = vstv %s936_s10 }
  0x3d   :  { %564 = vmatprep.subr.bf16.mxu0 %v789_v0  ;;  %570 = vmatprep.subr.bf16.mxu1 %v789_v0  ;;  %v107_v3 = vld [vmem:[#allocation6] sm:$0xff]  ;;  %vm119_vm1 = vcmask 130048   ;;  %v105_v4 = vld [vmem:[#allocation3] sm:$0xff]  ;;  %v634_v7 = vld [vmem:[#allocation9 + $0x38] sm:$0xff]   ;;  %vm497_vm2 = vcmask 57344  }
  0x3e   :  { %566 = vmatprep.mubr.msk.bf16.mxu0 %vm790_vm0, %v789_v0  ;;  %572 = vmatprep.mubr.msk.bf16.mxu1 %vm790_vm0, %v789_v0  ;;  %v108_v5 = vpack.c.bf16 %v107_v3, %v107_v3  ;;  %v106_v6 = vpack.c.bf16 %v105_v4, %v105_v4  ;;  %v635_v8 = vld [vmem:[#allocation9 + $0x30] sm:$0xff]   ;;  %v636_v9 = vld [vmem:[#allocation9 + $0x28] sm:$0xff]   ;;  %v637_v10 = vld [vmem:[#allocation9 + $0x20] sm:$0xff]  }
  0x3f   :  { %565 = vmatpush3.bf16.msra.mxu0 %v632_v1  ;;  %571 = vmatpush3.bf16.msra.mxu1 %v633_v2  ;;  %v638_v11 = vld [vmem:[#allocation9 + $0x18] sm:$0xff]   ;;  %v639_v12 = vld [vmem:[#allocation9 + $0x10] sm:$0xff]   ;;  %v640_v13 = vld [vmem:[#allocation9 + $0x8] sm:$0xff]  }
  0x40   :  { %576 = vmatprep.subr.bf16.mxu0 %v789_v0  ;;  %596 = vmatprep.subr.bf16.mxu1 %v789_v0  ;;  %v641_v14 = vld [vmem:[#allocation9] sm:$0xff]   ;;  %v642_v15 = vld [vmem:[#allocation11 + $0x38] sm:$0xff]   ;;  %v643_v16 = vld [vmem:[#allocation11 + $0x30] sm:$0xff]  }
  0x41   :  { %v644_v17 = vld [vmem:[#allocation11 + $0x28] sm:$0xff]   ;;  %v645_v18 = vld [vmem:[#allocation11 + $0x20] sm:$0xff]   ;;  %v646_v19 = vld [vmem:[#allocation11 + $0x18] sm:$0xff]  }
  0x42   :  { %567 = vmatmul.mubr.msk.bf16.vlgmr.msra.gmra.mxu0 %vm119_vm1, %v108_v5  ;;  %573 = vmatmul.mubr.msk.bf16.vlgmr.msra.gmra.mxu1 %vm119_vm1, %v106_v6  ;;  %v647_v20 = vld [vmem:[#allocation11 + $0x10] sm:$0xff]   ;;  %v520_v23 = vld [vmem:[%s930_s4] ss:$0 sm:$0xff]  ;;  %v649_v35 = vld [vmem:[#allocation11] sm:$0xff]  }
  0x43   :  { %577 = vmatpush3.bf16.msra.mxu0 %v634_v7  ;;  %592 = vmatprep.mubr.msk.bf16.mxu0 %vm790_vm0, %v789_v0  ;;  %v648_v34 = vld [vmem:[#allocation11 + $0x8] sm:$0xff]  }
  0x44   :  { %578 = vmatprep.subr.bf16.mxu0 %v789_v0  ;;  %612 = vmatprep.mubr.msk.bf16.mxu1 %vm790_vm0, %v789_v0  ;;  %v521_v36 = vld [vmem:[%s932_s6] ss:$0 sm:$0xff] }
  0x45   :  { %597 = vmatpush3.bf16.msra.mxu1 %v642_v15  ;;  %v530_v44 = vld [vmem:[%s934_s8] ss:$0 sm:$0xff]  ;;  %s791_s8 = smov [#allocation12]  }
  0x46   :  { %598 = vmatprep.subr.bf16.mxu1 %v789_v0  ;;  %v447_v52 = vld [vmem:[%s935_s9] sm:$0x1]  ;;  %s505_s29 = sshll.u32 %s791_s8, 4  ;;  %s506_s29 = int_to_ptr.vmem [resolvable:$true] %s505_s29 }
  0x47   :  { %579 = vmatpush3.bf16.msra.mxu0 %v635_v8  ;;  %s754_s9 = scalar_lea.vmem %s506_s29, 16  ;;  %s758_s30 = scalar_lea.vmem %s506_s29, 32 }
  0x48   :  { %580 = vmatprep.subr.bf16.mxu0 %v789_v0  ;;  %p755_p11 = scmp.ne.s32.totalorder %s506_s29, %s754_s9  ;;  %p759_p12 = scmp.lt.s32.totalorder %s506_s29, %s506_s29 }
  0x49   :  { %599 = vmatpush3.bf16.msra.mxu1 %v643_v16  ;;  %p760_p13 = scmp.lt.s32.totalorder %s758_s30, %s754_s9 }
  0x4a   :  { %600 = vmatprep.subr.bf16.mxu1 %v789_v0 }
  0x4b   :  { %581 = vmatpush3.bf16.msra.mxu0 %v636_v9  ;;  %p761_p0 = por %p760_p13, %p759_p12 }
  0x4c   :  { %582 = vmatprep.subr.bf16.mxu0 %v789_v0 }
  0x4d   :  { %601 = vmatpush3.bf16.msra.mxu1 %v644_v17  ;;  %p762_p1 = pnand %p761_p0, %p755_p11 }
  0x4e   :  { %602 = vmatprep.subr.bf16.mxu1 %v789_v0 }
  0x4f   :  { %583 = vmatpush3.bf16.msra.mxu0 %v637_v10 }
  0x50   :  { %584 = vmatprep.subr.bf16.mxu0 %v789_v0 }
  0x51   :  { %603 = vmatpush3.bf16.msra.mxu1 %v645_v18 }
  0x52   :  { %604 = vmatprep.subr.bf16.mxu1 %v789_v0 }
  0x53   :  { %585 = vmatpush3.bf16.msra.mxu0 %v638_v11 }
  0x54   :  { %586 = vmatprep.subr.bf16.mxu0 %v789_v0 }
  0x55   :  { %605 = vmatpush3.bf16.msra.mxu1 %v646_v19 }
  0x56   :  { %606 = vmatprep.subr.bf16.mxu1 %v789_v0 }
  0x57   :  { %587 = vmatpush3.bf16.msra.mxu0 %v639_v12 }
  0x58   :  { %588 = vmatprep.subr.bf16.mxu0 %v789_v0 }
  0x59   :  { %607 = vmatpush3.bf16.msra.mxu1 %v647_v20 }
  0x5a   :  { %608 = vmatprep.subr.bf16.mxu1 %v789_v0 }
  0x5b   :  { %589 = vmatpush3.bf16.msra.mxu0 %v640_v13 }
  0x5c   :  { %590 = vmatprep.subr.bf16.mxu0 %v789_v0 }
  0x5d   :  { %609 = vmatpush3.bf16.msra.mxu1 %v648_v34 }
  0x5e   :  { %610 = vmatprep.subr.bf16.mxu1 %v789_v0 }
  0x5f   :  { %591 = vmatpush3.bf16.msra.mxu0 %v641_v14 }
  0x60   :  { %616 = vmatprep.subr.bf16.mxu0 %v789_v0 }
  0x61   :  { %611 = vmatpush3.bf16.msra.mxu1 %v649_v35 }
 0x102   :  { %v157_v21 = vpop.f32.mrf.mxu0  ;;  %v206_v22 = vpop.f32.mrf.mxu1 }
 0x103   :  { %v207_v24 = vadd.f32 %v206_v22, %v157_v21 }
 0x104   :  { %v568_v25 = vpop.f32.mrf.mxu0  ;;  %v574_v26 = vpop.f32.mrf.mxu1 }
 0x105   :  { %v219_v27 = vadd.f32 %v520_v23, %v207_v24 }
 0x106   :  { %v160_v28 = vpop.f32.mrf.mxu0  ;;  %v209_v29 = vpop.f32.mrf.mxu1 }
 0x107   :  { %v220_v30 = vmax.f32 %v219_v27, 0.0 }
 0x108   :  { %v569_v31 = vpop.f32.mrf.mxu0  ;;  %v575_v32 = vpop.f32.mrf.mxu1 }
 0x109   :  { %v221_v33 = vpack.c.bf16 %v220_v30, %v220_v30 }
 0x10b   :  { %593 = vmatmul.mubr.bf16.vlgmr.msra.gmra.mxu0 %v221_v33 }
 0x10c   :  { %618 = vmatprep.mubr.msk.bf16.mxu0 %vm790_vm0, %v789_v0 }
 0x1cb   :  { %v327_v37 = vpop.f32.mrf.mxu0 }
 0x1cc   :  { %v328_v38 = vadd.f32 %v521_v36, %v327_v37 }
 0x1cd   :  { %v594_v39 = vpop.f32.mrf.mxu0 }
 0x1ce   :  { %v333_v40 = vmax.f32 %v328_v38, 0.0 }
 0x1cf   :  { %v330_v41 = vpop.f32.mrf.mxu0 }
 0x1d0   :  { %v334_v42 = vpack.c.bf16 %v333_v40, %v333_v40 }
 0x1d1   :  { %v595_v43 = vpop.f32.mrf.mxu0 }
 0x1d2   :  { %613 = vmatmul.mubr.bf16.vlgmr.msra.gmra.mxu1 %v334_v42 }
 0x292   :  { %v440_v45 = vpop.f32.mrf.mxu1 }
 0x293   :  { %v441_v46 = vadd.f32 %v530_v44, %v440_v45 }
 0x294   :  { %v614_v47 = vpop.f32.mrf.mxu1 }
 0x295   :  { %v446_v48 = vmax.f32 %v441_v46, 0.0 }
 0x296   :  { %v443_v49 = vpop.f32.mrf.mxu1 }
 0x297   :  { %v448_v50 = vpack.c.bf16 %v446_v48, %v446_v48 }
 0x298   :  { %v615_v51 = vpop.f32.mrf.mxu1 }
 0x299   :  { %617 = vmatpush3.bf16.xpose.msra.mxu0 %v448_v50 }
 0x2a0   :  { %619 = vmatmul.mubr.bf16.vlgmr.msra.gmra.mxu0 %v447_v52 }
 0x360   :  { %v485_v54 = vpop.f32.mrf.mxu0 }
 0x361   :  { %v486_v55 = vadd.f32 %v485_v54, %v450_v53 }
 0x362   :  { %v620_v56 = vpop.f32.mrf.mxu0 }
 0x363   :  { %v539_v57 = vmul.f32 -1.442695, %v486_v55 }
 0x364   :  { %v488_v58 = vpop.f32.mrf.mxu0 }
 0x365   :  { %650 = vpow2.f32 %v539_v57 }
 0x366   :  { %v621_v59 = vpop.f32.mrf.mxu0 }
 0x372   :  { %v651_v60 = vpop.eup %650 }
 0x373   :  { %v494_v61 = vadd.f32 1.0, %v651_v60 }
 0x375   :  { %652 = vrcp.f32 %v494_v61 }
 0x382   :  { %v653_v62 = vpop.eup %652 }
 0x383   :  { %498 = vst.msk [vmem:[#allocation12] sm:$0x1] %vm497_vm2, %v653_v62 }
 0x384   :  { %765 = shalt.err (!%p762_p1)
}
 0x385   :  { %508 = dma.vmem_to_hbm [thread:$0]  %s506_s29, 16, %s937_s11, [#allocation5]  }
 0x386   :  { %780 = dma.done.wait [#allocation5], 16  }
 0x387   :  { %781 = vsyncadd [#allocation5], 4294967280 }
 0x388   :  { %512 = vsyncpa [#allocation4], 1 }
 0x389   :  { %513 = vsyncpa [#allocation7], 1 }
 0x38a   :  { %514 = vsyncpa [#allocation10], 1 }
 0x38b   :  { %515 = vsyncpa [#allocation5], 1 }

</bundles_post_ra>
